<compile_context>
chip_gen: v7x
topology: tpu7x:2x2x1
jax: 0.10.0
libtpu: 0.0.40
codegen_flags: <defaults>
</compile_context>

<pallas_src>
import functools
import math

import jax
import jax.numpy as jnp
from jax.experimental import pallas as pl
from jax.experimental.pallas import tpu as pltpu


LANE = 128              # vreg lane width / MXU column width
DEFAULT_TILE_N = 256    # node-row tile (sublane axis), multiple of 8
DEFAULT_TILE_K = 256    # contraction tile for a_norm @ h, multiple of 128
_VMEM_LIMIT = 32 * 1024 * 1024   # safe scoped limit on v5e / v6e / v7x


def _round_up(x, m):
    return ((x + m - 1) // m) * m


def _pad2(x, rows, cols):
    return jnp.pad(x, ((0, rows - x.shape[0]), (0, cols - x.shape[1])))


# ----------------------------- Pallas kernels -----------------------------

def _linear_kernel(x_ref, w_ref, b_ref, o_ref, *, relu):
    # y = x @ W + b  (optionally ReLU); bf16 MXU inputs, f32 accumulate.
    y = jnp.dot(x_ref[...].astype(jnp.bfloat16), w_ref[...],
                preferred_element_type=jnp.float32)
    y = y + b_ref[...]
    if relu:
        y = jnp.maximum(y, 0.0)
    o_ref[...] = y.astype(o_ref.dtype)


def _gcnii_conv_kernel(a_ref, h_ref, h0_ref, m_ref, o_ref, acc_ref, *, alpha):
    # a_ref is the (1-alpha)-scaled normalized adjacency tile (bf16).
    # m_ref is the folded layer weight M = (1-beta)*I + beta*W (bf16).
    #   acc  = sum_k a_tile(i,k) @ h_tile(k)        (f32 accumulator)
    #   out  = relu((acc + alpha*h0_tile) @ M)
    k = pl.program_id(1)

    @pl.when(k == 0)
    def _():
        acc_ref[...] = jnp.zeros_like(acc_ref)

    acc_ref[...] += jnp.dot(a_ref[...],
                            h_ref[...].astype(jnp.bfloat16),
                            preferred_element_type=jnp.float32)

    @pl.when(k == pl.num_programs(1) - 1)
    def _():
        t = acc_ref[...] + alpha * h0_ref[...]
        y = jnp.dot(t.astype(jnp.bfloat16), m_ref[...],
                    preferred_element_type=jnp.float32)
        o_ref[...] = jnp.maximum(y, 0.0).astype(o_ref.dtype)


# ----------------------------- wrappers -----------------------------

def pallas_linear(x, w_bf16, b, *, relu, tile_n):
    """x: [Np, Fin_p] f32, w: [Fin_p, Fout_p] bf16, b: [1, Fout_p] f32."""
    Np, Fin_p = x.shape
    Fout_p = w_bf16.shape[1]
    assert Np % tile_n == 0 and Fin_p % LANE == 0 and Fout_p % LANE == 0
    grid = (pl.cdiv(Np, tile_n),)
    return pl.pallas_call(
        functools.partial(_linear_kernel, relu=relu),
        out_shape=jax.ShapeDtypeStruct((Np, Fout_p), jnp.float32),
        grid_spec=pltpu.PrefetchScalarGridSpec(
            num_scalar_prefetch=0,
            grid=grid,
            in_specs=[
                pl.BlockSpec((tile_n, Fin_p), lambda i: (i, 0)),
                pl.BlockSpec((Fin_p, Fout_p), lambda i: (0, 0)),
                pl.BlockSpec((1, Fout_p), lambda i: (0, 0)),
            ],
            out_specs=pl.BlockSpec((tile_n, Fout_p), lambda i: (i, 0)),
        ),
        compiler_params=pltpu.CompilerParams(
            dimension_semantics=("parallel",),
            vmem_limit_bytes=_VMEM_LIMIT),
    )(x, w_bf16, b)


def pallas_gcnii_conv(a_scaled_bf16, h, h0, m_bf16, *, alpha, tile_n, tile_k):
    """a: [Np, Np] bf16 (pre-scaled by 1-alpha), h/h0: [Np, Hp] f32,
    m: [Hp, Hp] bf16 -> relu(conv) [Np, Hp] f32."""
    Np, Hp = h.shape
    assert Np % tile_n == 0 and Np % tile_k == 0 and Hp % LANE == 0
    assert tile_n % 8 == 0 and tile_k % LANE == 0
    grid = (pl.cdiv(Np, tile_n), pl.cdiv(Np, tile_k))
    return pl.pallas_call(
        functools.partial(_gcnii_conv_kernel, alpha=alpha),
        out_shape=jax.ShapeDtypeStruct((Np, Hp), jnp.float32),
        grid_spec=pltpu.PrefetchScalarGridSpec(
            num_scalar_prefetch=0,
            grid=grid,
            in_specs=[
                pl.BlockSpec((tile_n, tile_k), lambda i, k: (i, k)),  # a_norm
                pl.BlockSpec((tile_k, Hp), lambda i, k: (k, 0)),      # h (rhs)
                pl.BlockSpec((tile_n, Hp), lambda i, k: (i, 0)),      # h0
                pl.BlockSpec((Hp, Hp), lambda i, k: (0, 0)),          # M
            ],
            out_specs=pl.BlockSpec((tile_n, Hp), lambda i, k: (i, 0)),
            scratch_shapes=[pltpu.VMEM((tile_n, Hp), jnp.float32)],
        ),
        compiler_params=pltpu.CompilerParams(
            dimension_semantics=("parallel", "arbitrary"),
            vmem_limit_bytes=_VMEM_LIMIT),
    )(a_scaled_bf16, h, h0, m_bf16)


# ----------------------------- GCNII model -----------------------------

def init_gcnii_params(key, in_size, out_size, hidden_size, n_layers):
    """Deterministic parameter init (same shapes as the torch module)."""
    keys = jax.random.split(key, 2 * (n_layers + 2))
    params = {}
    k = 1.0 / math.sqrt(in_size)
    params["w_in"] = jax.random.uniform(keys[0], (in_size, hidden_size),
                                        jnp.float32, -k, k)
    params["b_in"] = jax.random.uniform(keys[1], (hidden_size,),
                                        jnp.float32, -k, k)
    kc = 1.0 / math.sqrt(hidden_size)
    params["w_conv"] = [
        jax.random.uniform(keys[2 + i], (hidden_size, hidden_size),
                           jnp.float32, -kc, kc)
        for i in range(n_layers)
    ]
    ko = 1.0 / math.sqrt(hidden_size)
    params["w_out"] = jax.random.uniform(keys[-2], (hidden_size, out_size),
                                         jnp.float32, -ko, ko)
    params["b_out"] = jax.random.uniform(keys[-1], (out_size,),
                                         jnp.float32, -ko, ko)
    return params


def build_a_norm(n_nodes):
    """Deterministic small graph (ring + a few chords); symmetric norm."""
    src = jnp.arange(n_nodes)
    dst = (src + 1) % n_nodes
    a = jnp.zeros((n_nodes, n_nodes), jnp.float32)
    a = a.at[dst, src].set(1.0)
    a = a.at[src, dst].set(1.0)
    a = a.at[0, n_nodes // 2].set(1.0)
    a = a.at[n_nodes // 2, 0].set(1.0)
    a_hat = a + jnp.eye(n_nodes, dtype=jnp.float32)
    d_hat = jnp.sum(a_hat, axis=1) ** (-0.5)
    return d_hat[:, None] * a_hat * d_hat[None, :]


def gcnii_forward(params, a_norm, feature, *, n_layers, lambda_, alpha,
                  tile_n=DEFAULT_TILE_N, tile_k=DEFAULT_TILE_K):
    """Eval-mode GCNII forward (dropout is identity)."""
    N, in_size = feature.shape
    hidden = params["w_in"].shape[1]
    out_size = params["w_out"].shape[1]

    # Lane-dense padding (done once): pad node count to the tile lcm and all
    # feature dims to multiples of 128.  Padded rows/cols are exact zeros in
    # a_norm / weights, so real rows are unaffected; sliced off at the end.
    Np = _round_up(N, math.lcm(tile_n, tile_k))
    Fin_p = _round_up(in_size, LANE)
    Hp = _round_up(hidden, LANE)
    Fout_p = _round_up(out_size, LANE)

    x_p = _pad2(feature, Np, Fin_p)
    w_in = _pad2(params["w_in"], Fin_p, Hp).astype(jnp.bfloat16)
    b_in = jnp.pad(params["b_in"], (0, Hp - hidden)).reshape(1, Hp)
    w_out = _pad2(params["w_out"], Hp, Fout_p).astype(jnp.bfloat16)
    b_out = jnp.pad(params["b_out"], (0, Fout_p - out_size)).reshape(1, Fout_p)

    # Pre-scale adjacency by (1-alpha) once; bf16 halves the O(N^2) traffic.
    a_p = (_pad2(a_norm, Np, Np) * (1.0 - alpha)).astype(jnp.bfloat16)

    # Fold identity mapping into the per-layer weight: M = (1-beta)I + beta*W.
    eye = jnp.eye(Hp, dtype=jnp.float32)
    m_layers = []
    for i in range(n_layers):
        beta = math.log(lambda_ / (i + 1) + 1.0)
        w_p = _pad2(params["w_conv"][i], Hp, Hp)
        m_layers.append(((1.0 - beta) * eye + beta * w_p).astype(jnp.bfloat16))

    h = pallas_linear(x_p, w_in, b_in, relu=True, tile_n=tile_n)
    h0 = h
    for i in range(n_layers):
        h = pallas_gcnii_conv(a_p, h, h0, m_layers[i],
                              alpha=alpha, tile_n=tile_n, tile_k=tile_k)
    out_p = pallas_linear(h, w_out, b_out, relu=False, tile_n=tile_n)
    return out_p[:N, :out_size]


# ----------------------------- reference (plain JAX, f32) -----------------------------

def gcnii_forward_ref(params, a_norm, feature, *, n_layers, lambda_, alpha):
    h = jnp.maximum(feature @ params["w_in"] + params["b_in"], 0.0)
    h0 = h
    for i in range(n_layers):
        beta = math.log(lambda_ / (i + 1) + 1.0)
        h = a_norm @ h
        h = (1 - alpha) * h + alpha * h0
        h = (1 - beta) * h + beta * (h @ params["w_conv"][i])
        h = jnp.maximum(h, 0.0)
    return h @ params["w_out"] + params["b_out"]


# ----------------------------- main -----------------------------

if __name__ == "__main__":
    N_NODES = 64
    IN_SIZE = 16
    HIDDEN = 32
    OUT_SIZE = 8
    N_LAYERS = 2
    LAMBDA = 0.5
    ALPHA = 0.1

    key = jax.random.PRNGKey(0)
    kfeat, kparam = jax.random.split(key)

    feature = jax.random.normal(kfeat, (N_NODES, IN_SIZE), jnp.float32)
    params = init_gcnii_params(kparam, IN_SIZE, OUT_SIZE, HIDDEN, N_LAYERS)
    a_norm = build_a_norm(N_NODES)

    out = gcnii_forward(params, a_norm, feature,
                        n_layers=N_LAYERS, lambda_=LAMBDA, alpha=ALPHA)
    out = jax.block_until_ready(out)

    ref = gcnii_forward_ref(params, a_norm, feature,
                            n_layers=N_LAYERS, lambda_=LAMBDA, alpha=ALPHA)
    assert out.shape == (N_NODES, OUT_SIZE)
    # bf16 MXU inputs with f32 accumulation -> re-baselined tolerance.
    assert jnp.allclose(out, ref, atol=5e-2, rtol=5e-2)

    print("KERNEL_OK")
</pallas_src>

<mosaic_0001>
module attributes {stable_mosaic.version = 11 : i64} {
  func.func @_linear_kernel(%arg0: i32, %arg1: memref<256x128xf32, #tpu.memory_space<vmem>>, %arg2: memref<128x128xbf16, #tpu.memory_space<vmem>>, %arg3: memref<1x128xf32, #tpu.memory_space<vmem>>, %arg4: memref<256x128xf32, #tpu.memory_space<vmem>>) attributes {dimension_semantics = [#tpu.dimension_semantics<parallel>], iteration_bounds = array<i64: 1>, scalar_prefetch = 0 : i64, scratch_operands = 0 : i64, tpu.core_type = #tpu.core_type<tc>, window_params = [{transform_indices = @transform_0, window_bounds = array<i64: 256, 128>}, {pipeline_mode = #tpu.pipeline_mode<synchronous>, transform_indices = @transform_1, window_bounds = array<i64: 128, 128>}, {pipeline_mode = #tpu.pipeline_mode<synchronous>, transform_indices = @transform_2, window_bounds = array<i64: 1, 128>}, {transform_indices = @transform_3, window_bounds = array<i64: 256, 128>}]} {
    %c0 = arith.constant 0 : index
    %c0_0 = arith.constant 0 : index
    %0 = vector.load %arg1[%c0, %c0_0] : memref<256x128xf32, #tpu.memory_space<vmem>>, vector<256x128xf32>
    %1 = arith.truncf %0 : vector<256x128xf32> to vector<256x128xbf16>
    %c0_1 = arith.constant 0 : index
    %c0_2 = arith.constant 0 : index
    %2 = vector.load %arg2[%c0_1, %c0_2] : memref<128x128xbf16, #tpu.memory_space<vmem>>, vector<128x128xbf16>
    %cst = arith.constant dense<0.000000e+00> : vector<256x128xf32>
    %3 = tpu.matmul %1, %2, %cst {dimension_numbers = #tpu.dot_dimension_numbers<[1], [0], [0], [1], [0, 0, 1, 1], [], []>} : vector<256x128xbf16>, vector<128x128xbf16>, vector<256x128xf32> -> vector<256x128xf32>
    %c0_3 = arith.constant 0 : index
    %c0_4 = arith.constant 0 : index
    %4 = vector.load %arg3[%c0_3, %c0_4] : memref<1x128xf32, #tpu.memory_space<vmem>>, vector<1x128xf32>
    %5 = vector.broadcast %4 : vector<1x128xf32> to vector<256x128xf32>
    %6 = arith.addf %3, %5 : vector<256x128xf32>
    %cst_5 = arith.constant 0.000000e+00 : f32
    %7 = vector.broadcast %cst_5 : f32 to vector<256x128xf32>
    %8 = arith.maximumf %6, %7 : vector<256x128xf32>
    %c0_6 = arith.constant 0 : index
    %c0_7 = arith.constant 0 : index
    %9 = vector.load %arg4[%c0_6, %c0_7] : memref<256x128xf32, #tpu.memory_space<vmem>>, vector<256x128xf32>
    tpu.vector_store %arg4[%c0_6, %c0_7], %8 {strides = array<i32>} : memref<256x128xf32, #tpu.memory_space<vmem>>, vector<256x128xf32>,
    return
  }
  func.func @transform_0(%arg0: i32) -> (i32, i32) {
    %c0_i32 = arith.constant 0 : i32
    %c0_i32_0 = arith.constant 0 : i32
    return %arg0, %c0_i32 : i32, i32
  }
  func.func @transform_1(%arg0: i32) -> (i32, i32) {
    %c0_i32 = arith.constant 0 : i32
    %c0_i32_0 = arith.constant 0 : i32
    %c0_i32_1 = arith.constant 0 : i32
    return %c0_i32, %c0_i32_0 : i32, i32
  }
  func.func @transform_2(%arg0: i32) -> (i32, i32) {
    %c0_i32 = arith.constant 0 : i32
    %c0_i32_0 = arith.constant 0 : i32
    %c0_i32_1 = arith.constant 0 : i32
    return %c0_i32, %c0_i32_0 : i32, i32
  }
  func.func @transform_3(%arg0: i32) -> (i32, i32) {
    %c0_i32 = arith.constant 0 : i32
    %c0_i32_0 = arith.constant 0 : i32
    return %arg0, %c0_i32 : i32, i32
  }
}

</mosaic_0001>

<bundles_post_ra>
// kernel: tpu_custom_call.1
= control target key start
LH: loop header
LB: loop body
LE: loop exit
PB: predicated region body
PF: predicated region fallthrough
CT: control target
= control target key end

     0   :  { %8 = vsyncpa [#allocation3], 0  ;;  %s696_s0 = inlined_call_operand.hbm [shape: f32[256,128], index: 0, kind: input, shape index: {}]   ;;  %s697_s1 = inlined_call_operand.hbm [shape: bf16[128,128], index: 1, kind: input, shape index: {}]   ;;  %s698_s2 = inlined_call_operand.vmem [shape: f32[1,128], index: 2, kind: input, shape index: {}]   ;;  %s699_s3 = inlined_call_operand.hbm [shape: f32[256,128], index: 3, kind: output, shape index: {}]  }
   0x1   :  { %9 = vsyncpa [#allocation6], 0 }
   0x2   :  { %10 = vsyncpa [#allocation4], 0  ;;  %s590_s12 = smov [#allocation2]   ;;  %s518_s16 = scalar_lea.hbm %s696_s0, 4096 }
   0x3   :  { %s16_s13 = sshll.u32 %s590_s12, 4  ;;  %p519_p0 = scmp.ne.s32.totalorder %s696_s0, %s518_s16  ;;  %s17_s13 = int_to_ptr.vmem [resolvable:$true] %s16_s13 }
   0x4   :  { %p522_p1 = scmp.lt.u32.totalorder %s518_s16, %s696_s0 }
   0x6   :  { %p524_p2 = pnand %p522_p1, %p519_p0 }
   0x8   :  { %527 = shalt.err (!%p524_p2)
}
   0x9   :  { %s528_s21 = scalar_lea.vmem %s17_s13, 4096  ;;  %p533_p4 = scmp.lt.s32.totalorder %s17_s13, %s17_s13 }
   0xa   :  { %p529_p3 = scmp.ne.s32.totalorder %s17_s13, %s528_s21  ;;  %p534_p5 = scmp.lt.s32.totalorder %s528_s21, %s528_s21 }
   0xc   :  { %p535_p6 = por %p534_p5, %p533_p4 }
   0xe   :  { %p536_p7 = pnand %p535_p6, %p529_p3 }
  0x10   :  { %539 = shalt.err (!%p536_p7)
}
  0x11   :  { %s591_s22 = smov 128   ;;  %s592_s23 = smov 8  }
  0x12   :  { %22 = dma.hbm_to_vmem [thread:$0]  %s696_s0, 4096, %s17_s13, [#allocation3], %s591_s22, %s591_s22, %s592_s23  }
  0x13   :  { %s593_s26 = smov [#allocation5]   ;;  %s540_s30 = scalar_lea.hbm %s697_s1, 1024 }
  0x14   :  { %s28_s27 = sshll.u32 %s593_s26, 4  ;;  %p541_p8 = scmp.ne.s32.totalorder %s697_s1, %s540_s30  ;;  %s29_s27 = int_to_ptr.vmem [resolvable:$true] %s28_s27 }
  0x15   :  { %p544_p9 = scmp.lt.u32.totalorder %s540_s30, %s697_s1 }
  0x17   :  { %p546_p10 = pnand %p544_p9, %p541_p8 }
  0x19   :  { %549 = shalt.err (!%p546_p10)
}
  0x1a   :  { %s550_s8 = scalar_lea.vmem %s29_s27, 1024  ;;  %p555_p12 = scmp.lt.s32.totalorder %s29_s27, %s29_s27 }
  0x1b   :  { %p551_p11 = scmp.ne.s32.totalorder %s29_s27, %s550_s8  ;;  %p556_p13 = scmp.lt.s32.totalorder %s550_s8, %s550_s8 }
  0x1d   :  { %p557_p0 = por %p556_p13, %p555_p12 }
  0x1f   :  { %p558_p1 = pnand %p557_p0, %p551_p11 }
  0x21   :  { %561 = shalt.err (!%p558_p1)
}
  0x22   :  { %s594_s0 = smov 64   ;;  %s595_s9 = smov 4  }
  0x23   :  { %34 = dma.hbm_to_vmem [thread:$0]  %s697_s1, 1024, %s29_s27, [#allocation6], %s594_s0, %s594_s0, %s595_s9  }
  0x24   :  { %584 = dma.done.wait [#allocation3], 4096  }
  0x25   :  { %585 = vsyncadd [#allocation3], 4294963200 }
  0x26   :  { %586 = dma.done.wait [#allocation6], 1024  }
  0x27   :  { %587 = vsyncadd [#allocation6], 4294966272  ;;  %v510_v0 = vld [vmem:[#allocation5] sm:$0xff]   ;;  %v511_v1 = vld [vmem:[#allocation5 + $0x8] sm:$0xff]  }
  0x28   :  { %439 = vmatprep.subr.bf16.mxu0 %v510_v0  ;;  %487 = vmatprep.subr.bf16.mxu1 %v510_v0  ;;  %v512_v2 = vld [vmem:[#allocation5 + $0x10] sm:$0xff]   ;;  %v513_v3 = vld [vmem:[#allocation5 + $0x18] sm:$0xff]   ;;  %v44_v4 = vld [vmem:[#allocation2] sm:$0xff] }
  0x29   :  { %440 = vmatpush3.bf16.msra.mxu0 %v510_v0  ;;  %495 = vmatpush3.bf16.msra.mxu1 %v510_v0  ;;  %v45_v5 = vld [vmem:[#allocation2 + $0x8] sm:$0xff]  ;;  %v60_v6 = vld [vmem:[#allocation2 + $0x80] sm:$0xff]  ;;  %v516_v12 = vld [vmem:[#allocation5 + $0x30] sm:$0xff]  }
  0x2a   :  { %441 = vmatprep.subr.bf16.mxu0 %v511_v1  ;;  %488 = vmatprep.subr.bf16.mxu1 %v511_v1  ;;  %v76_v7 = vpack.c.bf16 %v45_v5, %v44_v4  ;;  %v61_v8 = vld [vmem:[#allocation2 + $0x88] sm:$0xff]  ;;  %v514_v10 = vld [vmem:[#allocation5 + $0x20] sm:$0xff]   ;;  %v517_v13 = vld [vmem:[#allocation5 + $0x38] sm:$0xff]  }
  0x2b   :  { %v84_v9 = vpack.c.bf16 %v61_v8, %v60_v6  ;;  %v515_v11 = vld [vmem:[#allocation5 + $0x28] sm:$0xff]   ;;  %v46_v14 = vld [vmem:[#allocation2 + $0x10] sm:$0xff]  ;;  %v47_v15 = vld [vmem:[#allocation2 + $0x18] sm:$0xff] }
  0x2c   :  { %455 = vmatprep.mubr.bf16.mxu0 %v76_v7  ;;  %v62_v16 = vld [vmem:[#allocation2 + $0x90] sm:$0xff]  ;;  %v63_v17 = vld [vmem:[#allocation2 + $0x98] sm:$0xff]  ;;  %v48_v18 = vld [vmem:[#allocation2 + $0x20] sm:$0xff]  ;;  %v77_v22 = vpack.c.bf16 %v47_v15, %v46_v14 }
  0x2d   :  { %442 = vmatpush3.bf16.msra.mxu0 %v511_v1  ;;  %496 = vmatpush3.bf16.msra.mxu1 %v511_v1  ;;  %v49_v19 = vld [vmem:[#allocation2 + $0x28] sm:$0xff]  ;;  %v64_v20 = vld [vmem:[#allocation2 + $0xa0] sm:$0xff]  ;;  %v85_v23 = vpack.c.bf16 %v63_v17, %v62_v16  ;;  %v50_v26 = vld [vmem:[#allocation2 + $0x30] sm:$0xff] }
  0x2e   :  { %443 = vmatprep.subr.bf16.mxu0 %v512_v2  ;;  %489 = vmatprep.subr.bf16.mxu1 %v512_v2  ;;  %v65_v21 = vld [vmem:[#allocation2 + $0xa8] sm:$0xff]  ;;  %v78_v24 = vpack.c.bf16 %v49_v19, %v48_v18  ;;  %v51_v27 = vld [vmem:[#allocation2 + $0x38] sm:$0xff]  ;;  %v66_v28 = vld [vmem:[#allocation2 + $0xb0] sm:$0xff] }
  0x2f   :  { %471 = vmatprep.mubr.bf16.mxu1 %v84_v9  ;;  %v86_v25 = vpack.c.bf16 %v65_v21, %v64_v20  ;;  %v67_v29 = vld [vmem:[#allocation2 + $0xb8] sm:$0xff]  ;;  %v52_v30 = vld [vmem:[#allocation2 + $0x40] sm:$0xff]  ;;  %v53_v31 = vld [vmem:[#allocation2 + $0x48] sm:$0xff]  ;;  %v79_v34 = vpack.c.bf16 %v51_v27, %v50_v26 }
  0x30   :  { %v68_v32 = vld [vmem:[#allocation2 + $0xc0] sm:$0xff]  ;;  %v69_v33 = vld [vmem:[#allocation2 + $0xc8] sm:$0xff]  ;;  %v87_v35 = vpack.c.bf16 %v67_v29, %v66_v28  ;;  %v80_v36 = vpack.c.bf16 %v53_v31, %v52_v30  ;;  %v54_v38 = vld [vmem:[#allocation2 + $0x50] sm:$0xff] }
  0x31   :  { %444 = vmatpush3.bf16.msra.mxu0 %v512_v2  ;;  %497 = vmatpush3.bf16.msra.mxu1 %v512_v2  ;;  %v88_v37 = vpack.c.bf16 %v69_v33, %v68_v32  ;;  %v55_v39 = vld [vmem:[#allocation2 + $0x58] sm:$0xff]  ;;  %v70_v40 = vld [vmem:[#allocation2 + $0xd0] sm:$0xff]  ;;  %v56_v42 = vld [vmem:[#allocation2 + $0x60] sm:$0xff] }
  0x32   :  { %445 = vmatprep.subr.bf16.mxu0 %v513_v3  ;;  %490 = vmatprep.subr.bf16.mxu1 %v513_v3  ;;  %v71_v41 = vld [vmem:[#allocation2 + $0xd8] sm:$0xff]  ;;  %v57_v43 = vld [vmem:[#allocation2 + $0x68] sm:$0xff]  ;;  %v72_v44 = vld [vmem:[#allocation2 + $0xe0] sm:$0xff]  ;;  %v81_v46 = vpack.c.bf16 %v55_v39, %v54_v38 }
  0x33   :  { %v73_v45 = vld [vmem:[#allocation2 + $0xe8] sm:$0xff]  ;;  %v89_v47 = vpack.c.bf16 %v71_v41, %v70_v40  ;;  %v82_v48 = vpack.c.bf16 %v57_v43, %v56_v42  ;;  %v58_v50 = vld [vmem:[#allocation2 + $0x70] sm:$0xff]  ;;  %v59_v51 = vld [vmem:[#allocation2 + $0x78] sm:$0xff] }
  0x34   :  { %v90_v49 = vpack.c.bf16 %v73_v45, %v72_v44  ;;  %v74_v52 = vld [vmem:[#allocation2 + $0xf0] sm:$0xff]  ;;  %v75_v53 = vld [vmem:[#allocation2 + $0xf8] sm:$0xff]  ;;  %v83_v54 = vpack.c.bf16 %v59_v51, %v58_v50  ;;  %v647_v56 = vld [vmem:[%s698_s2] ss:$0 sm:$0xff]  ;;  %s596_s2 = smov [#allocation7]  }
  0x35   :  { %446 = vmatpush3.bf16.msra.mxu0 %v513_v3  ;;  %498 = vmatpush3.bf16.msra.mxu1 %v513_v3  ;;  %v91_v55 = vpack.c.bf16 %v75_v53, %v74_v52  ;;  %s393_s13 = sshll.u32 %s596_s2, 4  ;;  %s394_s13 = int_to_ptr.vmem [resolvable:$true] %s393_s13 }
  0x36   :  { %447 = vmatprep.subr.bf16.mxu0 %v514_v10  ;;  %491 = vmatprep.subr.bf16.mxu1 %v514_v10  ;;  %s562_s14 = scalar_lea.vmem %s394_s13, 4096  ;;  %p567_p3 = scmp.lt.s32.totalorder %s394_s13, %s394_s13 }
  0x37   :  { %p563_p2 = scmp.ne.s32.totalorder %s394_s13, %s562_s14  ;;  %p568_p4 = scmp.lt.s32.totalorder %s562_s14, %s562_s14 }
  0x39   :  { %448 = vmatpush3.bf16.msra.mxu0 %v514_v10  ;;  %499 = vmatpush3.bf16.msra.mxu1 %v514_v10  ;;  %p569_p5 = por %p568_p4, %p567_p3 }
  0x3a   :  { %449 = vmatprep.subr.bf16.mxu0 %v515_v11  ;;  %492 = vmatprep.subr.bf16.mxu1 %v515_v11 }
  0x3b   :  { %p570_p6 = pnand %p569_p5, %p563_p2 }
  0x3d   :  { %450 = vmatpush3.bf16.msra.mxu0 %v515_v11  ;;  %500 = vmatpush3.bf16.msra.mxu1 %v515_v11 }
  0x3e   :  { %451 = vmatprep.subr.bf16.mxu0 %v516_v12  ;;  %493 = vmatprep.subr.bf16.mxu1 %v516_v12 }
  0x41   :  { %452 = vmatpush3.bf16.msra.mxu0 %v516_v12  ;;  %501 = vmatpush3.bf16.msra.mxu1 %v516_v12 }
  0x42   :  { %453 = vmatprep.subr.bf16.mxu0 %v517_v13  ;;  %494 = vmatprep.subr.bf16.mxu1 %v517_v13 }
  0x45   :  { %454 = vmatpush3.bf16.msra.mxu0 %v517_v13  ;;  %502 = vmatpush3.bf16.msra.mxu1 %v517_v13 }
  0x48   :  { %456 = vmatmul.mubr.bf16.vlgmr.msra.gmra.mrb[0].mxu0 %v77_v22  ;;  %472 = vmatmul.mubr.bf16.vlgmr.msra.gmra.mrb[0].mxu1 %v85_v23 }
  0x49   :  { %459 = vmatprep.mubr.bf16.mxu0 %v78_v24  ;;  %475 = vmatprep.mubr.bf16.mxu1 %v86_v25 }
  0x50   :  { %460 = vmatmul.mubr.bf16.gmra.mrb[4].mxu0 %v79_v34  ;;  %476 = vmatmul.mubr.bf16.gmra.mrb[4].mxu1 %v87_v35 }
  0x51   :  { %463 = vmatprep.mubr.bf16.mxu0 %v80_v36  ;;  %479 = vmatprep.mubr.bf16.mxu1 %v88_v37 }
  0x58   :  { %464 = vmatmul.mubr.bf16.gmra.mrb[8].mxu0 %v81_v46  ;;  %480 = vmatmul.mubr.bf16.gmra.mrb[8].mxu1 %v89_v47 }
  0x59   :  { %467 = vmatprep.mubr.bf16.mxu0 %v82_v48  ;;  %483 = vmatprep.mubr.bf16.mxu1 %v90_v49 }
  0x60   :  { %468 = vmatmul.mubr.bf16.gmra.mrb[12].mxu0 %v83_v54  ;;  %484 = vmatmul.mubr.bf16.gmra.mrb[12].mxu1 %v91_v55 }
 0x11b   :  { %v457_v57 = vpop.f32.mrb[0].mxu0  ;;  %v473_v58 = vpop.f32.mrb[0].mxu1 }
 0x11c   :  { %v206_v59 = vadd.f32 %v457_v57, %v647_v56  ;;  %v270_v60 = vadd.f32 %v473_v58, %v647_v56  ;;  %v197_v61 = vpop.f32.mrb[1].mxu0  ;;  %v261_v62 = vpop.f32.mrb[1].mxu1 }
 0x11d   :  { %v198_v63 = vadd.f32 %v647_v56, %v197_v61  ;;  %v262_v0 = vadd.f32 %v647_v56, %v261_v62  ;;  %v458_v1 = vpop.f32.mrb[2].mxu0  ;;  %v474_v2 = vpop.f32.mrb[2].mxu1 }
 0x11e   :  { %v326_v3 = vmax.f32 %v206_v59, 0.0  ;;  %v342_v4 = vmax.f32 %v270_v60, 0.0  ;;  %v209_v5 = vadd.f32 %v458_v1, %v647_v56  ;;  %v273_v6 = vadd.f32 %v474_v2, %v647_v56  ;;  %v200_v7 = vpop.f32.mrb[3].mxu0  ;;  %v264_v8 = vpop.f32.mrb[3].mxu1 }
 0x11f   :  { %v324_v9 = vmax.f32 %v198_v63, 0.0  ;;  %v340_v10 = vmax.f32 %v262_v0, 0.0  ;;  %v201_v11 = vadd.f32 %v647_v56, %v200_v7  ;;  %v265_v12 = vadd.f32 %v647_v56, %v264_v8 }
 0x120   :  { %358 = vst [vmem:[#allocation7 + $0x10] sm:$0xff] %v326_v3  ;;  %374 = vst [vmem:[#allocation7 + $0x90] sm:$0xff] %v342_v4  ;;  %v327_v13 = vmax.f32 %v209_v5, 0.0  ;;  %v343_v14 = vmax.f32 %v273_v6, 0.0 }
 0x121   :  { %356 = vst [vmem:[#allocation7] sm:$0xff] %v324_v9  ;;  %372 = vst [vmem:[#allocation7 + $0x80] sm:$0xff] %v340_v10  ;;  %v325_v15 = vmax.f32 %v201_v11, 0.0  ;;  %v341_v16 = vmax.f32 %v265_v12, 0.0 }
 0x122   :  { %359 = vst [vmem:[#allocation7 + $0x18] sm:$0xff] %v327_v13  ;;  %375 = vst [vmem:[#allocation7 + $0x98] sm:$0xff] %v343_v14 }
 0x123   :  { %357 = vst [vmem:[#allocation7 + $0x8] sm:$0xff] %v325_v15  ;;  %373 = vst [vmem:[#allocation7 + $0x88] sm:$0xff] %v341_v16  ;;  %v461_v17 = vpop.f32.mrb[4].mxu0  ;;  %v477_v18 = vpop.f32.mrb[4].mxu1 }
 0x124   :  { %v222_v19 = vadd.f32 %v461_v17, %v647_v56  ;;  %v286_v20 = vadd.f32 %v477_v18, %v647_v56  ;;  %v213_v21 = vpop.f32.mrb[5].mxu0  ;;  %v277_v22 = vpop.f32.mrb[5].mxu1 }
 0x125   :  { %v214_v23 = vadd.f32 %v647_v56, %v213_v21  ;;  %v278_v24 = vadd.f32 %v647_v56, %v277_v22  ;;  %v462_v25 = vpop.f32.mrb[6].mxu0  ;;  %v478_v26 = vpop.f32.mrb[6].mxu1 }
 0x126   :  { %v330_v27 = vmax.f32 %v222_v19, 0.0  ;;  %v346_v28 = vmax.f32 %v286_v20, 0.0  ;;  %v225_v29 = vadd.f32 %v462_v25, %v647_v56  ;;  %v289_v30 = vadd.f32 %v478_v26, %v647_v56  ;;  %v216_v31 = vpop.f32.mrb[7].mxu0  ;;  %v280_v32 = vpop.f32.mrb[7].mxu1 }
 0x127   :  { %v328_v33 = vmax.f32 %v214_v23, 0.0  ;;  %v344_v34 = vmax.f32 %v278_v24, 0.0  ;;  %v217_v35 = vadd.f32 %v647_v56, %v216_v31  ;;  %v281_v36 = vadd.f32 %v647_v56, %v280_v32 }
 0x128   :  { %362 = vst [vmem:[#allocation7 + $0x30] sm:$0xff] %v330_v27  ;;  %378 = vst [vmem:[#allocation7 + $0xb0] sm:$0xff] %v346_v28  ;;  %v331_v37 = vmax.f32 %v225_v29, 0.0  ;;  %v347_v38 = vmax.f32 %v289_v30, 0.0 }
 0x129   :  { %360 = vst [vmem:[#allocation7 + $0x20] sm:$0xff] %v328_v33  ;;  %376 = vst [vmem:[#allocation7 + $0xa0] sm:$0xff] %v344_v34  ;;  %v329_v39 = vmax.f32 %v217_v35, 0.0  ;;  %v345_v40 = vmax.f32 %v281_v36, 0.0 }
 0x12a   :  { %363 = vst [vmem:[#allocation7 + $0x38] sm:$0xff] %v331_v37  ;;  %379 = vst [vmem:[#allocation7 + $0xb8] sm:$0xff] %v347_v38 }
 0x12b   :  { %361 = vst [vmem:[#allocation7 + $0x28] sm:$0xff] %v329_v39  ;;  %377 = vst [vmem:[#allocation7 + $0xa8] sm:$0xff] %v345_v40  ;;  %v465_v41 = vpop.f32.mrb[8].mxu0  ;;  %v481_v42 = vpop.f32.mrb[8].mxu1 }
 0x12c   :  { %v238_v43 = vadd.f32 %v465_v41, %v647_v56  ;;  %v302_v44 = vadd.f32 %v481_v42, %v647_v56  ;;  %v229_v45 = vpop.f32.mrb[9].mxu0  ;;  %v293_v46 = vpop.f32.mrb[9].mxu1 }
 0x12d   :  { %v230_v47 = vadd.f32 %v647_v56, %v229_v45  ;;  %v294_v48 = vadd.f32 %v647_v56, %v293_v46  ;;  %v466_v49 = vpop.f32.mrb[10].mxu0  ;;  %v482_v50 = vpop.f32.mrb[10].mxu1 }
 0x12e   :  { %v334_v51 = vmax.f32 %v238_v43, 0.0  ;;  %v350_v52 = vmax.f32 %v302_v44, 0.0  ;;  %v241_v53 = vadd.f32 %v466_v49, %v647_v56  ;;  %v305_v54 = vadd.f32 %v482_v50, %v647_v56  ;;  %v232_v55 = vpop.f32.mrb[11].mxu0  ;;  %v296_v57 = vpop.f32.mrb[11].mxu1 }
 0x12f   :  { %v332_v58 = vmax.f32 %v230_v47, 0.0  ;;  %v348_v59 = vmax.f32 %v294_v48, 0.0  ;;  %v233_v60 = vadd.f32 %v647_v56, %v232_v55  ;;  %v297_v61 = vadd.f32 %v647_v56, %v296_v57 }
 0x130   :  { %366 = vst [vmem:[#allocation7 + $0x50] sm:$0xff] %v334_v51  ;;  %382 = vst [vmem:[#allocation7 + $0xd0] sm:$0xff] %v350_v52  ;;  %v335_v62 = vmax.f32 %v241_v53, 0.0  ;;  %v351_v63 = vmax.f32 %v305_v54, 0.0 }
 0x131   :  { %364 = vst [vmem:[#allocation7 + $0x40] sm:$0xff] %v332_v58  ;;  %380 = vst [vmem:[#allocation7 + $0xc0] sm:$0xff] %v348_v59  ;;  %v333_v0 = vmax.f32 %v233_v60, 0.0  ;;  %v349_v1 = vmax.f32 %v297_v61, 0.0 }
 0x132   :  { %367 = vst [vmem:[#allocation7 + $0x58] sm:$0xff] %v335_v62  ;;  %383 = vst [vmem:[#allocation7 + $0xd8] sm:$0xff] %v351_v63 }
 0x133   :  { %365 = vst [vmem:[#allocation7 + $0x48] sm:$0xff] %v333_v0  ;;  %381 = vst [vmem:[#allocation7 + $0xc8] sm:$0xff] %v349_v1  ;;  %v469_v2 = vpop.f32.mrb[12].mxu0  ;;  %v485_v3 = vpop.f32.mrb[12].mxu1 }
 0x134   :  { %v254_v4 = vadd.f32 %v469_v2, %v647_v56  ;;  %v318_v5 = vadd.f32 %v485_v3, %v647_v56  ;;  %v245_v6 = vpop.f32.mrb[13].mxu0  ;;  %v309_v7 = vpop.f32.mrb[13].mxu1 }
 0x135   :  { %v246_v8 = vadd.f32 %v647_v56, %v245_v6  ;;  %v310_v9 = vadd.f32 %v647_v56, %v309_v7  ;;  %v470_v10 = vpop.f32.mrb[14].mxu0  ;;  %v486_v11 = vpop.f32.mrb[14].mxu1 }
 0x136   :  { %v338_v12 = vmax.f32 %v254_v4, 0.0  ;;  %v354_v13 = vmax.f32 %v318_v5, 0.0  ;;  %v257_v14 = vadd.f32 %v470_v10, %v647_v56  ;;  %v321_v15 = vadd.f32 %v486_v11, %v647_v56  ;;  %v248_v16 = vpop.f32.mrb[15].mxu0  ;;  %v312_v17 = vpop.f32.mrb[15].mxu1 }
 0x137   :  { %v336_v18 = vmax.f32 %v246_v8, 0.0  ;;  %v352_v19 = vmax.f32 %v310_v9, 0.0  ;;  %v249_v20 = vadd.f32 %v647_v56, %v248_v16  ;;  %v313_v21 = vadd.f32 %v647_v56, %v312_v17 }
 0x138   :  { %370 = vst [vmem:[#allocation7 + $0x70] sm:$0xff] %v338_v12  ;;  %386 = vst [vmem:[#allocation7 + $0xf0] sm:$0xff] %v354_v13  ;;  %v339_v22 = vmax.f32 %v257_v14, 0.0  ;;  %v355_v23 = vmax.f32 %v321_v15, 0.0 }
 0x139   :  { %368 = vst [vmem:[#allocation7 + $0x60] sm:$0xff] %v336_v18  ;;  %384 = vst [vmem:[#allocation7 + $0xe0] sm:$0xff] %v352_v19  ;;  %v337_v24 = vmax.f32 %v249_v20, 0.0  ;;  %v353_v25 = vmax.f32 %v313_v21, 0.0 }
 0x13a   :  { %371 = vst [vmem:[#allocation7 + $0x78] sm:$0xff] %v339_v22  ;;  %387 = vst [vmem:[#allocation7 + $0xf8] sm:$0xff] %v355_v23 }
 0x13b   :  { %369 = vst [vmem:[#allocation7 + $0x68] sm:$0xff] %v337_v24  ;;  %385 = vst [vmem:[#allocation7 + $0xe8] sm:$0xff] %v353_v25 }
 0x13c   :  { %573 = shalt.err (!%p570_p6)
}
 0x13d   :  { %s574_s17 = scalar_lea.hbm %s699_s3, 4096 }
 0x13e   :  { %p575_p7 = scmp.ne.s32.totalorder %s699_s3, %s574_s17  ;;  %p578_p8 = scmp.lt.u32.totalorder %s574_s17, %s699_s3 }
 0x140   :  { %p580_p9 = pnand %p578_p8, %p575_p7 }
 0x142   :  { %583 = shalt.err (!%p580_p9)
}
 0x143   :  { %399 = dma.vmem_to_hbm [thread:$0]  %s394_s13, 4096, %s699_s3, [#allocation4], %s591_s22, %s591_s22, %s592_s23  }
 0x144   :  { %588 = dma.done.wait [#allocation4], 4096  }
 0x145   :  { %589 = vsyncadd [#allocation4], 4294963200 }
 0x146   :  { %403 = vsyncpa [#allocation3], 1 }
 0x147   :  { %404 = vsyncpa [#allocation6], 1 }
 0x148   :  { %405 = vsyncpa [#allocation4], 1 }

</bundles_post_ra>
